<compile_context>
chip_gen: v7x
topology: tpu7x:2x2x1
jax: 0.10.0
libtpu: 0.0.40
codegen_flags: <defaults>
</compile_context>

<pallas_src>
import functools

import jax
import jax.numpy as jnp
from jax import lax
from jax.experimental import pallas as pl
from jax.experimental.pallas import tpu as pltpu

_LANES = 128
_MIB = 1024 * 1024


def _round_up(v: int, m: int) -> int:
    return ((v + m - 1) // m) * m


def _sublane(itemsize: int) -> int:
    # Sublane alignment: 8 rows for 4-byte dtypes, 16 for bf16, 32 for int8.
    return max(8, 32 // max(1, itemsize))


def _tile_budget_bytes() -> int:
    """Per-pipelined-buffer byte budget, chip-aware.

    v7x (~3.2 TB/s): a 2 MiB step is only ~1.3 us, so the ~0.35 us per-step
      overhead costs 20-25% of roofline; 6 MiB tiles cut that to <10%.
    v6e (~1.4 TB/s): 4 MiB steps are ~6 us -> >=94% of roofline.
    v5e / older / unknown (<=0.9 TB/s): 2 MiB already keeps overhead <8% and
      bigger tiles only add VMEM pressure (16 MiB scoped default).
    """
    try:
        kind = jax.devices()[0].device_kind.lower()
    except Exception:
        kind = ""
    if "v6" in kind:
        return 4 * _MIB
    if "v7" in kind or "7x" in kind:
        return 6 * _MIB
    return 2 * _MIB


def _vmem_limit_bytes(tile_bytes: int) -> int:
    """~8x tile (in/out double-buffered + f32 intermediates headroom), clamped
    to <=75% of physical VMEM and <=48 MiB (safe on v7x's 64 MiB per TC)."""
    try:
        cap = int(pltpu.get_tpu_info().vmem_capacity_bytes)
    except Exception:
        cap = 64 * _MIB  # conservative default: v7x per-TensorCore VMEM
    want = max(16 * _MIB, 8 * tile_bytes)
    return int(min(want, (3 * cap) // 4, 48 * _MIB))


def _choose_tile_rows(n_rows: int, row_bytes: int, itemsize: int,
                      budget_bytes: int) -> int:
    """Rows per tile: as big as the byte budget allows (no row cap), rounded
    to the sublane multiple, and split so the 1-D 'parallel' grid has >=2
    steps whenever possible (both TensorCores stream on megacore / v7x)."""
    sub = _sublane(itemsize)
    tile = max(sub, (budget_bytes // max(1, row_bytes)) // sub * sub)
    if tile >= n_rows:
        if n_rows >= 2 * sub:
            # Split the single block into (at least) 2 grid steps.
            tile = _round_up(pl.cdiv(n_rows, 2), sub)
        elif n_rows < sub or n_rows % sub == 0:
            tile = n_rows                     # single full-extent block
        else:
            tile = _round_up(n_rows, sub)     # single padded block
    return tile


def _jnp_l2_norm(x, eps):
    """Plain-JAX reference / tiny-input path (fusable into consumers)."""
    xf = x.astype(jnp.float32)
    norm = jnp.sqrt(jnp.sum(xf * xf, axis=-1, keepdims=True))
    return (xf / jnp.maximum(norm, eps)).astype(x.dtype)


def _l2_norm_rows_kernel(x_ref, o_ref, *, eps, eps_sq, use_rsqrt):
    """x_ref: (tile_n, D) tile; L2-normalize each row over D (lane axis).

    Padded rows of the ragged last block may hold arbitrary bytes; each row's
    result depends only on that row and padded rows are masked on writeback,
    so garbage never leaks into real outputs (safe-by-masking).
    """
    xf = x_ref[...].astype(jnp.float32)
    sq = jnp.sum(xf * xf, axis=-1, keepdims=True)
    if use_rsqrt:
        # 1/clamp(sqrt(sq), eps) == rsqrt(max(sq, eps^2)) (sqrt is monotone);
        # rsqrt rides the EUP slot and the divide becomes a VPU multiply.
        inv = lax.rsqrt(jnp.maximum(sq, eps_sq))
    else:
        # eps^2 would underflow f32: clamp the norm itself (rare, exact).
        inv = 1.0 / jnp.maximum(jnp.sqrt(sq), eps)
    # Re-read the ref for the scale instead of keeping the f32 upcast live
    # across the reduce (cheap vld slots; no f32 shadow of the whole tile).
    o_ref[...] = (x_ref[...].astype(jnp.float32) * inv).astype(o_ref.dtype)


def _l2_norm_lane_dense_kernel(x_ref, o_ref, *, seg_d, eps, eps_sq,
                               use_rsqrt):
    """Lane-dense path for D < 128 with 128 % D == 0 (D is a power of two).

    x_ref: (tile_m, 128); each 128-lane row packs 128//seg_d consecutive
    logical rows of width seg_d. Per-segment sums of squares are computed
    with a constant 128x128 block-diagonal matrix of ones on the otherwise
    idle MXU; the result comes back already broadcast to every lane of its
    segment, so loads/stores stay full-width (no masked partial stores).
    Padded lane-rows of the ragged last block are masked on writeback and
    never mix with real rows (the matmul is per-row).
    """
    xf = x_ref[...].astype(jnp.float32)
    shift = int(seg_d).bit_length() - 1      # seg_d divides 128 -> power of 2
    seg_i = lax.broadcasted_iota(jnp.int32, (_LANES, _LANES), 0) >> shift
    seg_j = lax.broadcasted_iota(jnp.int32, (_LANES, _LANES), 1) >> shift
    blockdiag = (seg_i == seg_j).astype(jnp.float32)
    seg_sq = jnp.dot(xf * xf, blockdiag,
                     preferred_element_type=jnp.float32,
                     precision=lax.Precision.HIGHEST)
    if use_rsqrt:
        inv = lax.rsqrt(jnp.maximum(seg_sq, eps_sq))
    else:
        inv = 1.0 / jnp.maximum(jnp.sqrt(seg_sq), eps)
    o_ref[...] = (x_ref[...].astype(jnp.float32) * inv).astype(o_ref.dtype)


class NegativesSamplerPallas:
    """JAX/Pallas port of the concrete parts of NegativesSampler."""

    def __init__(self, l2_norm: bool, l2_norm_eps: float, *,
                 min_pallas_bytes: int = 256 * 1024,
                 lane_dense_repack: bool = True) -> None:
        self._l2_norm = bool(l2_norm)
        self._l2_norm_eps = float(l2_norm_eps)
        # Inputs smaller than this skip pallas_call entirely: a single-step
        # launch is dominated by fixed setup and the jnp expression can fuse
        # into the consumer (no extra HBM round trip).
        self._min_pallas_bytes = int(min_pallas_bytes)
        self._lane_dense_repack = bool(lane_dense_repack)

    def normalize_embeddings(self, x: jnp.ndarray) -> jnp.ndarray:
        return self._maybe_l2_norm(x)

    def _maybe_l2_norm(self, x: jnp.ndarray) -> jnp.ndarray:
        if not self._l2_norm:
            # Identity path: no kernel, no HBM round trip.
            return x

        eps = self._l2_norm_eps
        d = int(x.shape[-1])
        itemsize = jnp.dtype(x.dtype).itemsize
        total_bytes = int(x.size) * itemsize

        if x.size == 0 or total_bytes < self._min_pallas_bytes:
            return _jnp_l2_norm(x, eps)

        orig_shape = x.shape
        n = int(x.size) // d

        # eps^2 in Python float64 (no premature underflow); decide at trace
        # time whether the rsqrt(max(sq, eps^2)) rewrite is numerically safe.
        eps_sq = eps * eps
        use_rsqrt = eps_sq >= float(jnp.finfo(jnp.float32).tiny)

        budget = _tile_budget_bytes()

        lane_dense = (self._lane_dense_repack and 0 < d < _LANES
                      and _LANES % d == 0 and (n * d) % _LANES == 0)

        if lane_dense:
            m = (n * d) // _LANES
            x2d = x.reshape(m, _LANES)          # contiguous -> free reshape
            width = _LANES
            kernel = functools.partial(
                _l2_norm_lane_dense_kernel, seg_d=d, eps=eps, eps_sq=eps_sq,
                use_rsqrt=use_rsqrt)
        else:
            m = n
            x2d = x.reshape(n, d)
            width = d
            kernel = functools.partial(
                _l2_norm_rows_kernel, eps=eps, eps_sq=eps_sq,
                use_rsqrt=use_rsqrt)

        tile_rows = _choose_tile_rows(m, width * itemsize, itemsize, budget)
        tile_bytes = tile_rows * width * itemsize
        grid = (pl.cdiv(m, tile_rows),)

        out = pl.pallas_call(
            kernel,
            out_shape=jax.ShapeDtypeStruct((m, width), x.dtype),
            grid_spec=pl.GridSpec(
                grid=grid,
                in_specs=[pl.BlockSpec((tile_rows, width), lambda i: (i, 0))],
                out_specs=pl.BlockSpec((tile_rows, width), lambda i: (i, 0)),
            ),
            compiler_params=pltpu.CompilerParams(
                # Row grid is embarrassingly parallel -> shard across the two
                # TensorCores on megacore / v7x (grid has >=2 steps by
                # construction whenever the input is big enough).
                dimension_semantics=("parallel",),
                vmem_limit_bytes=_vmem_limit_bytes(tile_bytes),
            ),
        )(x2d)
        return out.reshape(orig_shape)


if __name__ == "__main__":
    eps = 1e-6
    key = jax.random.PRNGKey(0)
    k0, k1, k2, k3, k4 = jax.random.split(key, 5)

    sampler = NegativesSamplerPallas(l2_norm=True, l2_norm_eps=eps)
    # Force the Pallas path even at tiny demo shapes.
    sampler_force = NegativesSamplerPallas(l2_norm=True, l2_norm_eps=eps,
                                           min_pallas_bytes=0)

    def check(y, x, atol=1e-5, rtol=1e-5):
        y_ref = _jnp_l2_norm(x, eps)
        assert y.shape == x.shape and y.dtype == x.dtype
        assert jnp.allclose(y.astype(jnp.float32), y_ref.astype(jnp.float32),
                            atol=atol, rtol=rtol), "result mismatch"

    # 1) Canonical small shape (batch=2, seq=8, hidden=32) through the Pallas
    #    lane-dense path (D=32 packs 4 logical rows per 128-lane vreg row).
    x_small = jax.random.normal(k0, (2, 8, 32), dtype=jnp.float32)
    y_small = jax.block_until_ready(sampler_force.normalize_embeddings(x_small))
    check(y_small, x_small)

    # 2) Lane-dense path with >=2 grid steps (D=64 -> 2 rows per lane row).
    x_ld = jax.random.normal(k1, (4, 512, 64), dtype=jnp.float32)
    y_ld = jax.block_until_ready(sampler.normalize_embeddings(x_ld))
    check(y_ld, x_ld)

    # 3) Standard row kernel, lane-aligned D=128, >=2 grid steps.
    x_d128 = jax.random.normal(k2, (2, 512, 128), dtype=jnp.float32)
    y_d128 = jax.block_until_ready(sampler.normalize_embeddings(x_d128))
    check(y_d128, x_d128)

    # 4) Ragged rows (261, not a multiple of 8) and D=96 (not a divisor of
    #    128): standard kernel with a padded last block.
    x_rag = jax.random.normal(k3, (3, 87, 96), dtype=jnp.float32)
    y_rag = jax.block_until_ready(sampler_force.normalize_embeddings(x_rag))
    check(y_rag, x_rag)

    # 5) bf16 input (sublane multiple 16) through the lane-dense path.
    x_bf16 = jax.random.normal(k4, (2, 256, 64), dtype=jnp.bfloat16)
    y_bf16 = jax.block_until_ready(sampler_force.normalize_embeddings(x_bf16))
    check(y_bf16, x_bf16, atol=1e-2, rtol=1e-2)

    # 6) Tiny-input bypass (default threshold) matches the kernel result.
    y_small_bypass = jax.block_until_ready(sampler.normalize_embeddings(x_small))
    assert jnp.allclose(y_small_bypass, y_small, atol=1e-5, rtol=1e-5)

    # 7) l2_norm=False path is a pure bypass (no kernel launch).
    sampler_id = NegativesSamplerPallas(l2_norm=False, l2_norm_eps=eps)
    y_id = jax.block_until_ready(sampler_id.normalize_embeddings(x_small))
    assert jnp.allclose(y_id, x_small)

    print("KERNEL_OK")
</pallas_src>

<mosaic_0001>
module attributes {stable_mosaic.version = 11 : i64} {
  func.func @_l2_norm_lane_dense_kernel(%arg0: i32, %arg1: memref<4x128xf32, #tpu.memory_space<vmem>>, %arg2: memref<4x128xf32, #tpu.memory_space<vmem>>) attributes {dimension_semantics = [#tpu.dimension_semantics<parallel>], iteration_bounds = array<i64: 1>, scalar_prefetch = 0 : i64, scratch_operands = 0 : i64, tpu.core_type = #tpu.core_type<tc>, window_params = [{transform_indices = @transform_0, window_bounds = array<i64: 4, 128>}, {transform_indices = @transform_1, window_bounds = array<i64: 4, 128>}]} {
    %c0 = arith.constant 0 : index
    %c0_0 = arith.constant 0 : index
    %0 = vector.load %arg1[%c0, %c0_0] : memref<4x128xf32, #tpu.memory_space<vmem>>, vector<4x128xf32>
    %1 = tpu.iota {dimensions = array<i32: 0>} : vector<128x128xi32>
    %c5_i32 = arith.constant 5 : i32
    %2 = vector.broadcast %c5_i32 : i32 to vector<128x128xi32>
    %3 = arith.shrsi %1, %2 : vector<128x128xi32>
    %4 = tpu.iota {dimensions = array<i32: 1>} : vector<128x128xi32>
    %c5_i32_1 = arith.constant 5 : i32
    %5 = vector.broadcast %c5_i32_1 : i32 to vector<128x128xi32>
    %6 = arith.shrsi %4, %5 : vector<128x128xi32>
    %7 = arith.cmpi eq, %3, %6 : vector<128x128xi32>
    %8 = arith.extui %7 : vector<128x128xi1> to vector<128x128xi32>
    %9 = arith.sitofp %8 : vector<128x128xi32> to vector<128x128xf32>
    %10 = arith.mulf %0, %0 : vector<4x128xf32>
    %cst = arith.constant dense<0.000000e+00> : vector<4x128xf32>
    %11 = tpu.matmul %10, %9, %cst {dimension_numbers = #tpu.dot_dimension_numbers<[1], [0], [0], [1], [0, 0, 1, 1], [], []>, precision = #tpu.contract_precision<fp32>} : vector<4x128xf32>, vector<128x128xf32>, vector<4x128xf32> -> vector<4x128xf32>
    %cst_2 = arith.constant 9.99999996E-13 : f32
    %12 = vector.broadcast %cst_2 : f32 to vector<4x128xf32>
    %13 = arith.maximumf %11, %12 : vector<4x128xf32>
    %14 = math.rsqrt %13 : vector<4x128xf32>
    %c0_3 = arith.constant 0 : index
    %c0_4 = arith.constant 0 : index
    %15 = vector.load %arg1[%c0_3, %c0_4] : memref<4x128xf32, #tpu.memory_space<vmem>>, vector<4x128xf32>
    %16 = arith.mulf %15, %14 : vector<4x128xf32>
    %c0_5 = arith.constant 0 : index
    %c0_6 = arith.constant 0 : index
    %17 = vector.load %arg2[%c0_5, %c0_6] : memref<4x128xf32, #tpu.memory_space<vmem>>, vector<4x128xf32>
    tpu.vector_store %arg2[%c0_5, %c0_6], %16 {strides = array<i32>} : memref<4x128xf32, #tpu.memory_space<vmem>>, vector<4x128xf32>,
    return
  }
  func.func @transform_0(%arg0: i32) -> (i32, i32) {
    %c0_i32 = arith.constant 0 : i32
    %c0_i32_0 = arith.constant 0 : i32
    return %arg0, %c0_i32 : i32, i32
  }
  func.func @transform_1(%arg0: i32) -> (i32, i32) {
    %c0_i32 = arith.constant 0 : i32
    %c0_i32_0 = arith.constant 0 : i32
    return %arg0, %c0_i32 : i32, i32
  }
}

</mosaic_0001>

<bundles_post_ra>
// kernel: tpu_custom_call.1
= control target key start
LH: loop header
LB: loop body
LE: loop exit
PB: predicated region body
PF: predicated region fallthrough
CT: control target
= control target key end

     0   :  { %6 = vsyncpa [#allocation3], 0  ;;  %s1836_s0 = inlined_call_operand.hbm [shape: f32[4,128], index: 0, kind: input, shape index: {}]   ;;  %s1837_s1 = inlined_call_operand.hbm [shape: f32[4,128], index: 1, kind: output, shape index: {}]  }
   0x1   :  { %7 = vsyncpa [#allocation4], 0  ;;  %s1352_s6 = smov [#allocation2]   ;;  %s1304_s10 = scalar_lea.hbm %s1836_s0, 64 }
   0x2   :  { %s14_s7 = sshll.u32 %s1352_s6, 4  ;;  %p1305_p0 = scmp.ne.s32.totalorder %s1836_s0, %s1304_s10  ;;  %s15_s7 = int_to_ptr.vmem [resolvable:$true] %s14_s7 }
   0x3   :  { %p1308_p1 = scmp.lt.u32.totalorder %s1304_s10, %s1836_s0 }
   0x5   :  { %p1310_p2 = pnand %p1308_p1, %p1305_p0 }
   0x7   :  { %1313 = shalt.err (!%p1310_p2)
}
   0x8   :  { %s1314_s15 = scalar_lea.vmem %s15_s7, 64  ;;  %p1319_p4 = scmp.lt.s32.totalorder %s15_s7, %s15_s7 }
   0x9   :  { %p1315_p3 = scmp.ne.s32.totalorder %s15_s7, %s1314_s15  ;;  %p1320_p5 = scmp.lt.s32.totalorder %s1314_s15, %s1314_s15 }
   0xb   :  { %p1321_p6 = por %p1320_p5, %p1319_p4 }
   0xd   :  { %p1322_p7 = pnand %p1321_p6, %p1315_p3 }
   0xf   :  { %1325 = shalt.err (!%p1322_p7)
}
  0x10   :  { %17 = dma.hbm_to_vmem [thread:$0]  %s1836_s0, 64, %s15_s7, [#allocation3]   ;;  %v22_v0 = vlaneseq }
  0x11   :  { %1348 = dma.done.wait [#allocation3], 64  }
  0x12   :  { %1349 = vsyncadd [#allocation3], 4294967232  ;;  %v1353_v1 = vmov 0.0|0.0   ;;  %v1382_v2 = vshrl.u32 %v22_v0, 7  ;;  %v56_v3 = vand.u32 127, %v22_v0  ;;  %vm1354_vm0 = vmmov 0  }
  0x13   :  { %1143 = vmatprep.subr.bf16.mxu1 %v1353_v1  ;;  %1215 = vmatprep.subr.bf16.mxu0 %v1353_v1  ;;  %v1355_v4 = vmov 0.0   ;;  %v1356_v24 = vmov 1.0|1.0   ;;  %v1544_v56 = vld [vmem:[#allocation2] sm:$0xf]  ;;  %s1357_s0 = smov [#allocation5]  }
  0x14   :  { %965 = vmatprep.mubr.msk.f32.mxu1 %vm1354_vm0, %v1355_v4  ;;  %1070 = vmatprep.mubr.msk.f32.mxu0 %vm1354_vm0, %v1355_v4  ;;  %v24_v5 = vadd.s32 8, %v1382_v2  ;;  %v39_v6 = vshra.s32 %v1382_v2, 5  ;;  %v1390_v7 = vshra.s32 %v56_v3, 5  ;;  %v25_v8 = vadd.s32 16, %v1382_v2  ;;  %s758_s18 = sshll.u32 %s1357_s0, 4  ;;  %s759_s18 = int_to_ptr.vmem [resolvable:$true] %s758_s18 }
  0x15   :  { %v26_v9 = vadd.s32 24, %v1382_v2  ;;  %v27_v10 = vadd.s32 32, %v1382_v2  ;;  %v28_v11 = vadd.s32 40, %v1382_v2  ;;  %v29_v16 = vadd.s32 48, %v1382_v2  ;;  %s1326_s19 = scalar_lea.vmem %s759_s18, 64  ;;  %p1331_p9 = scmp.lt.s32.totalorder %s759_s18, %s759_s18 }
  0x16   :  { %v40_v12 = vshra.s32 %v24_v5, 5  ;;  %vm1397_vm1 = vcmp.eq.s32.totalorder %v39_v6, %v1390_v7  ;;  %v41_v14 = vshra.s32 %v25_v8, 5  ;;  %v30_v17 = vadd.s32 56, %v1382_v2  ;;  %p1327_p8 = scmp.ne.s32.totalorder %s759_s18, %s1326_s19  ;;  %p1332_p10 = scmp.lt.s32.totalorder %s1326_s19, %s1326_s19 }
  0x17   :  { %v42_v15 = vshra.s32 %v26_v9, 5  ;;  %v43_v20 = vshra.s32 %v27_v10, 5  ;;  %v44_v21 = vshra.s32 %v28_v11, 5  ;;  %v45_v28 = vshra.s32 %v29_v16, 5 }
  0x18   :  { %vm1404_vm2 = vcmp.eq.s32.totalorder %v40_v12, %v1390_v7  ;;  %vm1409_vm3 = vcmp.eq.s32.totalorder %v41_v14, %v1390_v7  ;;  %v46_v29 = vshra.s32 %v30_v17, 5  ;;  %v767_v30 = vsel %vm1397_vm1, 1.0, %v1355_v4  ;;  %p1333_p11 = por %p1332_p10, %p1331_p9 }
  0x19   :  { %vm1417_vm4 = vmpackc.low %vm1404_vm2, %vm1397_vm1  ;;  %vm1422_vm5 = vcmp.eq.s32.totalorder %v42_v15, %v1390_v7  ;;  %vm1443_vm7 = vcmp.eq.s32.totalorder %v43_v20, %v1390_v7  ;;  %vm1448_vm8 = vcmp.eq.s32.totalorder %v44_v21, %v1390_v7  ;;  %vm1472_vm10 = vcmp.eq.s32.totalorder %v45_v28, %v1390_v7 }
  0x1a   :  { %1145 = vmatpush3.bf16.msk.msra.mxu1 %vm1417_vm4, %v1356_v24  ;;  %1217 = vmatpush3.bf16.msk.msra.mxu0 %vm1417_vm4, %v1356_v24  ;;  %vm1438_vm6 = vmpackc.low %vm1422_vm5, %vm1409_vm3  ;;  %vm1477_vm11 = vcmp.eq.s32.totalorder %v46_v29, %v1390_v7  ;;  %v31_v34 = vadd.s32 64, %v1382_v2  ;;  %v32_v35 = vadd.s32 72, %v1382_v2  ;;  %v33_v36 = vadd.s32 80, %v1382_v2  ;;  %p1334_p12 = pnand %p1333_p11, %p1327_p8 }
  0x1b   :  { %1146 = vmatprep.subr.bf16.mxu1 %v1353_v1  ;;  %1218 = vmatprep.subr.bf16.mxu0 %v1353_v1  ;;  %vm1467_vm9 = vmpackc.low %vm1448_vm8, %vm1443_vm7  ;;  %v34_v37 = vadd.s32 88, %v1382_v2  ;;  %v768_v38 = vsel %vm1404_vm2, 1.0, %v1355_v4  ;;  %v1494_v41 = vsub.f32 %v767_v30, %v767_v30  ;;  %v35_v43 = vadd.s32 96, %v1382_v2 }
  0x1c   :  { %v47_v39 = vshra.s32 %v31_v34, 5  ;;  %v48_v40 = vshra.s32 %v32_v35, 5  ;;  %vm1502_vm12 = vmpackc.low %vm1477_vm11, %vm1472_vm10  ;;  %v36_v44 = vadd.s32 104, %v1382_v2  ;;  %v49_v47 = vshra.s32 %v33_v36, 5 }
  0x1d   :  { %v50_v48 = vshra.s32 %v34_v37, 5  ;;  %v1518_v49 = vsub.f32 %v768_v38, %v768_v38  ;;  %v769_v50 = vsel %vm1409_vm3, 1.0, %v1355_v4  ;;  %v201_v51 = vand.u32 4294901760, %v1494_v41 }
  0x1e   :  { %1148 = vmatpush3.bf16.msk.msra.mxu1 %vm1438_vm6, %v1356_v24  ;;  %1220 = vmatpush3.bf16.msk.msra.mxu0 %vm1438_vm6, %v1356_v24  ;;  %vm1509_vm13 = vcmp.eq.s32.totalorder %v47_v39, %v1390_v7  ;;  %vm1514_vm14 = vcmp.eq.s32.totalorder %v48_v40, %v1390_v7  ;;  %v770_v52 = vsel %vm1422_vm5, 1.0, %v1355_v4  ;;  %v51_v54 = vshra.s32 %v35_v43, 5 }
  0x1f   :  { %1149 = vmatprep.subr.bf16.mxu1 %v1353_v1  ;;  %1221 = vmatprep.subr.bf16.mxu0 %v1353_v1  ;;  %vm1539_vm15 = vmpackc.low %vm1514_vm14, %vm1509_vm13  ;;  %v37_v55 = vadd.s32 112, %v1382_v2  ;;  %vm1547_vm1 = vcmp.eq.s32.totalorder %v49_v47, %v1390_v7  ;;  %vm1552_vm2 = vcmp.eq.s32.totalorder %v50_v48, %v1390_v7  ;;  %v52_v59 = vshra.s32 %v36_v44, 5 }
  0x20   :  { %v38_v60 = vadd.s32 120, %v1382_v2  ;;  %v208_v61 = vand.u32 4294901760, %v1518_v49  ;;  %v1558_v62 = vsub.f32 %v769_v50, %v769_v50  ;;  %v1560_v63 = vsub.f32 %v770_v52, %v770_v52  ;;  %vm1588_vm3 = vmpackc.low %vm1552_vm2, %vm1547_vm1 }
  0x21   :  { %v771_v0 = vsel %vm1443_vm7, 1.0, %v1355_v4  ;;  %v106_v2 = vmul.f32 %v1544_v56, %v1544_v56  ;;  %v202_v3 = vsub.f32 %v1494_v41, %v201_v51  ;;  %v772_v5 = vsel %vm1448_vm8, 1.0, %v1355_v4 }
  0x22   :  { %1151 = vmatpush3.bf16.msk.msra.mxu1 %vm1467_vm9, %v1356_v24  ;;  %1223 = vmatpush3.bf16.msk.msra.mxu0 %vm1467_vm9, %v1356_v24  ;;  %v773_v6 = vsel %vm1472_vm10, 1.0, %v1355_v4  ;;  %vm1593_vm5 = vcmp.eq.s32.totalorder %v51_v54, %v1390_v7  ;;  %vm1598_vm7 = vcmp.eq.s32.totalorder %v52_v59, %v1390_v7  ;;  %v53_v11 = vshra.s32 %v37_v55, 5 }
  0x23   :  { %1152 = vmatprep.subr.bf16.mxu1 %v1353_v1  ;;  %1224 = vmatprep.subr.bf16.mxu0 %v1353_v1  ;;  %v54_v12 = vshra.s32 %v38_v60, 5  ;;  %v1602_v13 = vand.u32 4294901760, %v106_v2  ;;  %v209_v14 = vsub.f32 %v1518_v49, %v208_v61  ;;  %v1605_v15 = vsub.f32 %v771_v0, %v771_v0  ;;  %vm1631_vm8 = vmpackc.low %vm1598_vm7, %vm1593_vm5 }
  0x24   :  { %v774_v16 = vsel %vm1477_vm11, 1.0, %v1355_v4  ;;  %v215_v17 = vand.u32 4294901760, %v1558_v62  ;;  %v222_v18 = vand.u32 4294901760, %v1560_v63  ;;  %v1612_v19 = vsub.f32 %v772_v5, %v772_v5 }
  0x25   :  { %v1621_v20 = vsub.f32 %v106_v2, %v1602_v13  ;;  %v203_v21 = vand.u32 4294901760, %v202_v3  ;;  %v1623_v23 = vsub.f32 %v773_v6, %v773_v6  ;;  %v1635_v27 = vsub.f32 %v774_v16, %v774_v16 }
  0x26   :  { %1154 = vmatpush3.bf16.msk.msra.mxu1 %vm1502_vm12, %v1356_v24  ;;  %1226 = vmatpush3.bf16.msk.msra.mxu0 %vm1502_vm12, %v1356_v24  ;;  %vm1638_vm10 = vcmp.eq.s32.totalorder %v53_v11, %v1390_v7  ;;  %vm1643_vm11 = vcmp.eq.s32.totalorder %v54_v12, %v1390_v7  ;;  %v210_v32 = vand.u32 4294901760, %v209_v14  ;;  %v229_v33 = vand.u32 4294901760, %v1605_v15 }
  0x27   :  { %1155 = vmatprep.subr.bf16.mxu1 %v1353_v1  ;;  %1227 = vmatprep.subr.bf16.mxu0 %v1353_v1  ;;  %v190_v30 = vand.u32 4294901760, %v1621_v20  ;;  %v775_v34 = vsel %vm1509_vm13, 1.0, %v1355_v4  ;;  %v776_v35 = vsel %vm1514_vm14, 1.0, %v1355_v4  ;;  %v236_v36 = vand.u32 4294901760, %v1612_v19  ;;  %vm1672_vm13 = vmpackc.low %vm1643_vm11, %vm1638_vm10 }
  0x28   :  { %v216_v37 = vsub.f32 %v1558_v62, %v215_v17  ;;  %v223_v38 = vsub.f32 %v1560_v63, %v222_v18  ;;  %v243_v39 = vand.u32 4294901760, %v1623_v23  ;;  %v250_v43 = vand.u32 4294901760, %v1635_v27 }
  0x29   :  { %v191_v7 = vsub.f32 %v1621_v20, %v190_v30  ;;  %v1677_v44 = vsub.f32 %v775_v34, %v775_v34  ;;  %v1679_v45 = vsub.f32 %v776_v35, %v776_v35  ;;  %v777_v46 = vsel %vm1547_vm1, 1.0, %v1355_v4 }
  0x2a   :  { %1157 = vmatpush3.bf16.msk.msra.mxu1 %vm1539_vm15, %v1356_v24  ;;  %1229 = vmatpush3.bf16.msk.msra.mxu0 %vm1539_vm15, %v1356_v24  ;;  %v778_v47 = vsel %vm1552_vm2, 1.0, %v1355_v4  ;;  %v1168_v50 = vpack.c.bf16 %v210_v32, %v203_v21  ;;  %v1240_v52 = vpack.c.bf16 %v208_v61, %v201_v51  ;;  %v217_v54 = vand.u32 4294901760, %v216_v37 }
  0x2b   :  { %1158 = vmatprep.subr.bf16.mxu1 %v1353_v1  ;;  %1230 = vmatprep.subr.bf16.mxu0 %v1353_v1  ;;  %v192_v48 = vand.u32 4294901760, %v191_v7  ;;  %v224_v55 = vand.u32 4294901760, %v223_v38  ;;  %v230_v57 = vsub.f32 %v1605_v15, %v229_v33  ;;  %v237_v58 = vsub.f32 %v1612_v19, %v236_v36 }
  0x2c   :  { %v257_v51 = vand.u32 4294901760, %v1677_v44  ;;  %v264_v59 = vand.u32 4294901760, %v1679_v45  ;;  %v1701_v60 = vsub.f32 %v777_v46, %v777_v46  ;;  %v1703_v61 = vsub.f32 %v778_v47, %v778_v47 }
  0x2d   :  { %v779_v0 = vsel %vm1593_vm5, 1.0, %v1355_v4  ;;  %v780_v2 = vsel %vm1598_vm7, 1.0, %v1355_v4  ;;  %v1243_v3 = vpack.c.bf16 %v222_v18, %v215_v17  ;;  %v244_v5 = vsub.f32 %v1623_v23, %v243_v39 }
  0x2e   :  { %1160 = vmatpush3.bf16.msk.msra.mxu1 %vm1588_vm3, %v1356_v24  ;;  %1232 = vmatpush3.bf16.msk.msra.mxu0 %vm1588_vm3, %v1356_v24  ;;  %v1171_v6 = vpack.c.bf16 %v224_v55, %v217_v54  ;;  %v231_v11 = vand.u32 4294901760, %v230_v57  ;;  %v238_v12 = vand.u32 4294901760, %v237_v58  ;;  %v251_v14 = vsub.f32 %v1635_v27, %v250_v43 }
  0x2f   :  { %1161 = vmatprep.subr.bf16.mxu1 %v1353_v1  ;;  %1233 = vmatprep.subr.bf16.mxu0 %v1353_v1  ;;  %v271_v9 = vand.u32 4294901760, %v1701_v60  ;;  %v278_v10 = vand.u32 4294901760, %v1703_v61  ;;  %v1717_v16 = vsub.f32 %v779_v0, %v779_v0  ;;  %v1719_v17 = vsub.f32 %v780_v2, %v780_v2 }
  0x30   :  { %v781_v18 = vsel %vm1638_vm10, 1.0, %v1355_v4  ;;  %v782_v21 = vsel %vm1643_vm11, 1.0, %v1355_v4  ;;  %v245_v32 = vand.u32 4294901760, %v244_v5  ;;  %v1174_v34 = vpack.c.bf16 %v238_v12, %v231_v11 }
  0x31   :  { %v252_v35 = vand.u32 4294901760, %v251_v14  ;;  %v258_v7 = vsub.f32 %v1677_v44, %v257_v51  ;;  %v265_v37 = vsub.f32 %v1679_v45, %v264_v59  ;;  %v285_v28 = vand.u32 4294901760, %v1717_v16 }
  0x32   :  { %1163 = vmatpush3.bf16.msk.msra.mxu1 %vm1631_vm8, %v1356_v24  ;;  %1235 = vmatpush3.bf16.msk.msra.mxu0 %vm1631_vm8, %v1356_v24  ;;  %v292_v38 = vand.u32 4294901760, %v1719_v17  ;;  %v1737_v29 = vsub.f32 %v781_v18, %v781_v18  ;;  %v272_v46 = vsub.f32 %v1701_v60, %v271_v9  ;;  %v1252_v57 = vpack.c.bf16 %v264_v59, %v257_v51 }
  0x33   :  { %1164 = vmatprep.subr.bf16.mxu1 %v1353_v1  ;;  %1236 = vmatprep.subr.bf16.mxu0 %v1353_v1  ;;  %v1177_v47 = vpack.c.bf16 %v252_v35, %v245_v32  ;;  %v1195_v32 = vpack.c.bf16 %v1560_v63, %v1558_v62  ;;  %v1198_v22 = vpack.c.bf16 %v1612_v19, %v1605_v15 }
  0x34   :  { %v299_v54 = vand.u32 4294901760, %v1737_v29  ;;  %v273_v58 = vand.u32 4294901760, %v272_v46  ;;  %v293_v2 = vsub.f32 %v1719_v17, %v292_v38  ;;  %v1258_v14 = vpack.c.bf16 %v292_v38, %v285_v28 }
  0x35   :  { %v1204_v25 = vpack.c.bf16 %v1679_v45, %v1677_v44  ;;  %v1207_v31 = vpack.c.bf16 %v1703_v61, %v1701_v60 }
  0x36   :  { %1166 = vmatpush3.bf16.msk.msra.mxu1 %vm1672_vm13, %v1356_v24  ;;  %1238 = vmatpush3.bf16.msk.msra.mxu0 %vm1672_vm13, %v1356_v24  ;;  %v294_v11 = vand.u32 4294901760, %v293_v2  ;;  %v300_v51 = vsub.f32 %v1737_v29, %v299_v54 }
  0x37   :  { %1167 = vmatprep.subr.bf16.mxu1 %v1353_v1  ;;  %1239 = vmatprep.subr.bf16.mxu0 %v1353_v1 }
  0x38   :  { %v301_v18 = vand.u32 4294901760, %v300_v51 }
  0x39   :  { %966 = vmatmul.mubr.f32.vlgmr.msra.gmra.mrb[0].mxu1 %v192_v48  ;;  %1071 = vmatmul.mubr.f32.vlgmr.msra.gmra.mrb[0].mxu0 %v190_v30  ;;  %v1246_v30 = vpack.c.bf16 %v236_v36, %v229_v33  ;;  %v1739_v33 = vsub.f32 %v782_v21, %v782_v21  ;;  %v1249_v36 = vpack.c.bf16 %v250_v43, %v243_v39  ;;  %v259_v48 = vand.u32 4294901760, %v258_v7 }
  0x3a   :  { %1169 = vmatpush3.bf16.msra.mxu1 %v1168_v50  ;;  %1241 = vmatpush3.bf16.msra.mxu0 %v1240_v52  ;;  %v266_v50 = vand.u32 4294901760, %v265_v37  ;;  %v279_v52 = vsub.f32 %v1703_v61, %v278_v10  ;;  %v286_v39 = vsub.f32 %v1717_v16, %v285_v28 }
  0x3b   :  { %1170 = vmatprep.subr.bf16.mxu1 %v1353_v1  ;;  %1242 = vmatprep.subr.bf16.mxu0 %v1353_v1  ;;  %v306_v55 = vand.u32 4294901760, %v1739_v33  ;;  %v1213_v42 = vpack.c.bf16 %v1739_v33, %v1737_v29 }
  0x3c   :  { %1000 = vmatprep.mubr.msk.f32.mxu1 %vm1354_vm0, %v1355_v4  ;;  %1105 = vmatprep.mubr.msk.f32.mxu0 %vm1354_vm0, %v1355_v4  ;;  %v1180_v43 = vpack.c.bf16 %v266_v50, %v259_v48  ;;  %v280_v0 = vand.u32 4294901760, %v279_v52  ;;  %v287_v5 = vand.u32 4294901760, %v286_v39 }
  0x3d   :  { %v307_v59 = vsub.f32 %v1739_v33, %v306_v55 }
  0x3e   :  { %1172 = vmatpush3.bf16.msra.mxu1 %v1171_v6  ;;  %1244 = vmatpush3.bf16.msra.mxu0 %v1243_v3  ;;  %v1255_v3 = vpack.c.bf16 %v278_v10, %v271_v9  ;;  %v1183_v6 = vpack.c.bf16 %v280_v0, %v273_v58  ;;  %v1186_v12 = vpack.c.bf16 %v294_v11, %v287_v5 }
  0x3f   :  { %1173 = vmatprep.subr.bf16.mxu1 %v1353_v1  ;;  %1245 = vmatprep.subr.bf16.mxu0 %v1353_v1  ;;  %v308_v21 = vand.u32 4294901760, %v307_v59  ;;  %v1261_v10 = vpack.c.bf16 %v306_v55, %v299_v54 }
  0x41   :  { %v1189_v9 = vpack.c.bf16 %v308_v21, %v301_v18 }
  0x42   :  { %1175 = vmatpush3.bf16.msra.mxu1 %v1174_v34  ;;  %1247 = vmatpush3.bf16.msra.mxu0 %v1246_v30  ;;  %v1192_v30 = vpack.c.bf16 %v1518_v49, %v1494_v41  ;;  %v1210_v41 = vpack.c.bf16 %v1719_v17, %v1717_v16 }
  0x43   :  { %1176 = vmatprep.subr.bf16.mxu1 %v1353_v1  ;;  %1248 = vmatprep.subr.bf16.mxu0 %v1353_v1 }
  0x46   :  { %1178 = vmatpush3.bf16.msra.mxu1 %v1177_v47  ;;  %1250 = vmatpush3.bf16.msra.mxu0 %v1249_v36 }
  0x47   :  { %1179 = vmatprep.subr.bf16.mxu1 %v1353_v1  ;;  %1251 = vmatprep.subr.bf16.mxu0 %v1353_v1 }
  0x4a   :  { %1181 = vmatpush3.bf16.msra.mxu1 %v1180_v43  ;;  %1253 = vmatpush3.bf16.msra.mxu0 %v1252_v57 }
  0x4b   :  { %1182 = vmatprep.subr.bf16.mxu1 %v1353_v1  ;;  %1254 = vmatprep.subr.bf16.mxu0 %v1353_v1 }
  0x4e   :  { %1184 = vmatpush3.bf16.msra.mxu1 %v1183_v6  ;;  %1256 = vmatpush3.bf16.msra.mxu0 %v1255_v3 }
  0x4f   :  { %1185 = vmatprep.subr.bf16.mxu1 %v1353_v1  ;;  %1257 = vmatprep.subr.bf16.mxu0 %v1353_v1 }
  0x52   :  { %1187 = vmatpush3.bf16.msra.mxu1 %v1186_v12  ;;  %1259 = vmatpush3.bf16.msra.mxu0 %v1258_v14 }
  0x53   :  { %1188 = vmatprep.subr.bf16.mxu1 %v1353_v1  ;;  %1260 = vmatprep.subr.bf16.mxu0 %v1353_v1 }
  0x56   :  { %1190 = vmatpush3.bf16.msra.mxu1 %v1189_v9  ;;  %1262 = vmatpush3.bf16.msra.mxu0 %v1261_v10 }
  0x57   :  { %1191 = vmatprep.subr.bf16.mxu1 %v1353_v1  ;;  %1263 = vmatprep.subr.bf16.mxu0 %v1353_v1 }
  0x59   :  { %1001 = vmatmul.mubr.f32.vlgmr.msra.gmra.mrb[0].mxu1 %v1602_v13  ;;  %1106 = vmatmul.mubr.f32.vlgmr.msra.gmra.mrb[0].mxu0 %v1602_v13 }
  0x5a   :  { %1193 = vmatpush3.bf16.msra.mxu1 %v1192_v30  ;;  %1265 = vmatpush3.bf16.msk.msra.mxu0 %vm1417_vm4, %v1356_v24 }
  0x5b   :  { %1194 = vmatprep.subr.bf16.mxu1 %v1353_v1  ;;  %1266 = vmatprep.subr.bf16.mxu0 %v1353_v1 }
  0x5c   :  { %1035 = vmatprep.mubr.msk.f32.mxu1 %vm1354_vm0, %v1355_v4  ;;  %1140 = vmatprep.mubr.msk.f32.mxu0 %vm1354_vm0, %v1355_v4  ;;  %v1201_v4 = vpack.c.bf16 %v1635_v27, %v1623_v23 }
  0x5e   :  { %1196 = vmatpush3.bf16.msra.mxu1 %v1195_v32  ;;  %1268 = vmatpush3.bf16.msk.msra.mxu0 %vm1438_vm6, %v1356_v24 }
  0x5f   :  { %1197 = vmatprep.subr.bf16.mxu1 %v1353_v1  ;;  %1269 = vmatprep.subr.bf16.mxu0 %v1353_v1 }
  0x62   :  { %1199 = vmatpush3.bf16.msra.mxu1 %v1198_v22  ;;  %1271 = vmatpush3.bf16.msk.msra.mxu0 %vm1467_vm9, %v1356_v24 }
  0x63   :  { %1200 = vmatprep.subr.bf16.mxu1 %v1353_v1  ;;  %1272 = vmatprep.subr.bf16.mxu0 %v1353_v1 }
  0x66   :  { %1202 = vmatpush3.bf16.msra.mxu1 %v1201_v4  ;;  %1274 = vmatpush3.bf16.msk.msra.mxu0 %vm1502_vm12, %v1356_v24 }
  0x67   :  { %1203 = vmatprep.subr.bf16.mxu1 %v1353_v1  ;;  %1275 = vmatprep.subr.bf16.mxu0 %v1353_v1 }
  0x6a   :  { %1205 = vmatpush3.bf16.msra.mxu1 %v1204_v25  ;;  %1277 = vmatpush3.bf16.msk.msra.mxu0 %vm1539_vm15, %v1356_v24 }
  0x6b   :  { %1206 = vmatprep.subr.bf16.mxu1 %v1353_v1  ;;  %1278 = vmatprep.subr.bf16.mxu0 %v1353_v1 }
  0x6e   :  { %1208 = vmatpush3.bf16.msra.mxu1 %v1207_v31  ;;  %1280 = vmatpush3.bf16.msk.msra.mxu0 %vm1588_vm3, %v1356_v24 }
  0x6f   :  { %1209 = vmatprep.subr.bf16.mxu1 %v1353_v1  ;;  %1281 = vmatprep.subr.bf16.mxu0 %v1353_v1 }
  0x72   :  { %1211 = vmatpush3.bf16.msra.mxu1 %v1210_v41  ;;  %1283 = vmatpush3.bf16.msk.msra.mxu0 %vm1631_vm8, %v1356_v24 }
  0x73   :  { %1212 = vmatprep.subr.bf16.mxu1 %v1353_v1  ;;  %1284 = vmatprep.subr.bf16.mxu0 %v1353_v1 }
  0x76   :  { %1214 = vmatpush3.bf16.msra.mxu1 %v1213_v42  ;;  %1286 = vmatpush3.bf16.msk.msra.mxu0 %vm1672_vm13, %v1356_v24 }
  0x79   :  { %1036 = vmatmul.mubr.f32.vlgmr.msra.gmra.mrb[0].mxu1 %v1621_v20  ;;  %1141 = vmatmul.mubr.f32.vlgmr.msra.gmra.mrb[0].mxu0 %v1602_v13 }
 0x14c   :  { %v449_v49 = vpop.f32.mrb[0].mxu1  ;;  %v744_v53 = vpop.f32.mrb[0].mxu0 }
 0x14d   :  { %v1287_v62 = vadd.f32 %v744_v53, %v449_v49  ;;  %v1037_v63 = vpop.f32.mrb[1].mxu1  ;;  %v1142_v8 = vpop.f32.mrb[1].mxu0 }
 0x14f   :  { %v748_v15 = vmax.f32 %v1287_v62, 1e-12 }
 0x151   :  { %1302 = vrsqrt.f32 %v748_v15 }
 0x15b   :  { %v1303_v19 = vpop.eup %1302 }
 0x15c   :  { %v750_v1 = vmul.f32 %v1303_v19, %v1544_v56 }
 0x15e   :  { %751 = vst [vmem:[#allocation5] sm:$0xf] %v750_v1 }
 0x15f   :  { %1337 = shalt.err (!%p1334_p12)
}
 0x160   :  { %s1338_s22 = scalar_lea.hbm %s1837_s1, 64 }
 0x161   :  { %p1339_p13 = scmp.ne.s32.totalorder %s1837_s1, %s1338_s22  ;;  %p1342_p0 = scmp.lt.u32.totalorder %s1338_s22, %s1837_s1 }
 0x163   :  { %p1344_p1 = pnand %p1342_p0, %p1339_p13 }
 0x165   :  { %1347 = shalt.err (!%p1344_p1)
}
 0x166   :  { %761 = dma.vmem_to_hbm [thread:$0]  %s759_s18, 64, %s1837_s1, [#allocation4]  }
 0x167   :  { %1350 = dma.done.wait [#allocation4], 64  }
 0x168   :  { %1351 = vsyncadd [#allocation4], 4294967232 }
 0x169   :  { %765 = vsyncpa [#allocation3], 1 }
 0x16a   :  { %766 = vsyncpa [#allocation4], 1 }

</bundles_post_ra>
